<compile_context>
chip_gen: v7x
topology: tpu7x:2x2x1
jax: 0.10.0
libtpu: 0.0.40
codegen_flags: <defaults>
</compile_context>

<pallas_src>
import jax
import jax.numpy as jnp
from jax.experimental import pallas as pl
from jax.experimental.pallas import tpu as pltpu


def _round_up(x, m):
    return (x + m - 1) // m * m


def _unsup_model_kernel(n_ref, x_ref, w1_ref, b1_ref, w2_ref, b2_ref,
                        pred_ref, psum_ref):
    """One node tile of: encoder + decoder + partial MSE sum.

    n_ref:    SMEM (1,) int32  -- true (unpadded) node count
    x_ref:    [TM, Dp] f32     -- node-feature tile (zero-padded rows/cols)
    w1_ref:   [Dp, Hp] bf16,  b1_ref: [1, Hp] f32
    w2_ref:   [Hp, Dp] bf16,  b2_ref: [1, Dp] f32
    pred_ref: [TM, Hp] f32     -- node embeddings (model prediction)
    psum_ref: [1, 8, Dp] f32   -- per-tile partial sum of squared error
                                  (replicated across the 8 sublanes; wrapper
                                   reads sublane 0)
    """
    tm = x_ref.shape[0]
    x = x_ref[...]                                           # f32 (TM, Dp)

    # Encoder: hidden = relu(x @ W1 + b1)   (bf16 MXU inputs, f32 accumulate)
    h = jnp.dot(x.astype(jnp.bfloat16), w1_ref[...],
                preferred_element_type=jnp.float32)
    h = jnp.maximum(h + b1_ref[...], 0.0)                    # f32 (TM, Hp)

    # Decoder: recon = hidden @ W2 + b2
    r = jnp.dot(h.astype(jnp.bfloat16), w2_ref[...],
                preferred_element_type=jnp.float32)
    r = r + b2_ref[...]                                      # f32 (TM, Dp)

    # Row-validity mask: padded rows (global index >= true N) contribute 0.
    row0 = pl.program_id(0) * tm
    rows = jax.lax.broadcasted_iota(jnp.int32, (tm, 1), 0) + row0
    valid = (rows < n_ref[0]).astype(jnp.float32)            # (TM, 1)

    diff = (r - x) * valid
    colsum = jnp.sum(diff * diff, axis=0)                    # (Dp,) per-lane SSE
    psum_ref[...] = jnp.broadcast_to(colsum[None, None, :], psum_ref.shape)

    pred_ref[...] = h


def unsupervised_model_pallas(x, w1, b1, w2, b2, *, tm=256):
    """Run the synthetic unsupervised autoencoder as one tiled Pallas call.

    Returns (pred [N, H] f32, loss scalar f32).
    """
    n, d = x.shape
    h = w1.shape[1]

    dp = _round_up(d, 128)                      # lane-dense feature dim
    hp = _round_up(h, 128)                      # lane-dense hidden dim
    tm = _round_up(max(8, min(tm, _round_up(n, 8))), 8)
    n_pad = _round_up(n, tm)
    grid_m = n_pad // tm

    # Zero-pad inputs / params; zero-padded weight rows & cols guarantee the
    # padded lanes contribute exactly 0 to the reconstruction error.
    xp = jnp.zeros((n_pad, dp), jnp.float32).at[:n, :d].set(x.astype(jnp.float32))
    w1p = jnp.zeros((dp, hp), jnp.float32).at[:d, :h].set(w1).astype(jnp.bfloat16)
    w2p = jnp.zeros((hp, dp), jnp.float32).at[:h, :d].set(w2).astype(jnp.bfloat16)
    b1p = jnp.zeros((1, hp), jnp.float32).at[:, :h].set(b1)
    b2p = jnp.zeros((1, dp), jnp.float32).at[:, :d].set(b2)
    n_valid = jnp.array([n], dtype=jnp.int32)

    pred_pad, psums = pl.pallas_call(
        _unsup_model_kernel,
        out_shape=(
            jax.ShapeDtypeStruct((n_pad, hp), jnp.float32),
            jax.ShapeDtypeStruct((grid_m, 8, dp), jnp.float32),
        ),
        grid_spec=pltpu.PrefetchScalarGridSpec(
            num_scalar_prefetch=1,                     # true node count -> SMEM
            grid=(grid_m,),
            in_specs=[
                pl.BlockSpec((tm, dp), lambda i, nv: (i, 0)),   # node tile
                pl.BlockSpec((dp, hp), lambda i, nv: (0, 0)),   # W1 resident
                pl.BlockSpec((1, hp), lambda i, nv: (0, 0)),    # b1 resident
                pl.BlockSpec((hp, dp), lambda i, nv: (0, 0)),   # W2 resident
                pl.BlockSpec((1, dp), lambda i, nv: (0, 0)),    # b2 resident
            ],
            out_specs=[
                pl.BlockSpec((tm, hp), lambda i, nv: (i, 0)),     # pred tile
                pl.BlockSpec((1, 8, dp), lambda i, nv: (i, 0, 0)),  # partial SSE
            ],
        ),
        compiler_params=pltpu.CompilerParams(
            dimension_semantics=("parallel",)),   # node tiles independent
    )(n_valid, xp, w1p, b1p, w2p, b2p)

    # Wrapper-side reduction of per-tile partial sums (keeps grid axis parallel).
    inv_n_elem = jnp.float32(1.0 / float(n * d))   # precomputed reciprocal
    loss = jnp.sum(psums[:, 0, :]) * inv_n_elem
    pred = pred_pad[:n, :h]
    return pred, loss


class UnsupervisedTask:
    """JAX port of torchdrug tasks.Unsupervised (wrapper semantics)."""

    def __init__(self, params, graph_construction_model=None):
        self.params = params
        # TODO(synk): graph_construction_model (graph augmentation) not ported;
        # passed through unchanged when None.
        self.graph_construction_model = graph_construction_model

    def _model(self, graph, node_feature, all_loss, metric):
        # The wrapped model computes the unsupervised loss and adds it to
        # all_loss / metric (mirrors torchdrug models' in-place `all_loss +=`).
        w1, b1, w2, b2 = self.params
        pred, loss = unsupervised_model_pallas(node_feature, w1, b1, w2, b2,
                                               tm=128)
        all_loss = all_loss + loss
        metric["unsupervised reconstruction loss"] = loss
        return pred, all_loss

    def predict(self, batch, all_loss=None, metric=None):
        graph = batch["graph"]
        if self.graph_construction_model is not None:
            graph = self.graph_construction_model(graph)
        node_feature = graph["node_feature"].astype(jnp.float32)
        pred, all_loss = self._model(graph, node_feature, all_loss, metric)
        # JAX arrays are immutable (no torch-style in-place += on a shared
        # tensor), so stash the updated loss for forward() to return.
        self._last_all_loss = all_loss
        return pred

    def forward(self, batch):
        all_loss = jnp.array(0.0, dtype=jnp.float32)
        metric = {}
        self._last_all_loss = all_loss
        _pred = self.predict(batch, all_loss, metric)
        return self._last_all_loss, metric


if __name__ == "__main__":
    key = jax.random.PRNGKey(0)
    k_x, k_w1, k_w2 = jax.random.split(key, 3)

    # A packed batch of graphs (torchdrug stacks nodes of a batch): 5 graphs of
    # 40 nodes -> 200 nodes, 32 input features, 32 hidden units.  With tm=128
    # this exercises multi-tile pipelining and the padded-row masking path.
    N, D_IN, HIDDEN = 200, 32, 32

    node_feature = jax.random.normal(k_x, (N, D_IN), dtype=jnp.float32)

    # Deterministic parameter init (Glorot-ish scaling).
    w1 = jax.random.normal(k_w1, (D_IN, HIDDEN), dtype=jnp.float32) * (1.0 / jnp.sqrt(D_IN))
    b1 = jnp.zeros((1, HIDDEN), dtype=jnp.float32)
    w2 = jax.random.normal(k_w2, (HIDDEN, D_IN), dtype=jnp.float32) * (1.0 / jnp.sqrt(HIDDEN))
    b2 = jnp.zeros((1, D_IN), dtype=jnp.float32)

    task = UnsupervisedTask(params=(w1, b1, w2, b2))

    batch = {"graph": {"node_feature": node_feature}}

    all_loss, metric = task.forward(batch)
    all_loss = jax.block_until_ready(all_loss)
    metric = {k: jax.block_until_ready(v) for k, v in metric.items()}

    # Pure-JAX reference with the same bf16 rounding of matmul inputs
    # (f32 accumulation), so the check is tight.
    xb = node_feature.astype(jnp.bfloat16).astype(jnp.float32)
    w1b = w1.astype(jnp.bfloat16).astype(jnp.float32)
    w2b = w2.astype(jnp.bfloat16).astype(jnp.float32)
    h_ref = jnp.maximum(xb @ w1b + b1, 0.0)
    r_ref = h_ref.astype(jnp.bfloat16).astype(jnp.float32) @ w2b + b2
    loss_ref = jnp.mean((r_ref - node_feature) ** 2)

    pred, _ = unsupervised_model_pallas(node_feature, w1, b1, w2, b2, tm=128)
    pred = jax.block_until_ready(pred)

    assert pred.shape == (N, HIDDEN), pred.shape
    assert jnp.allclose(all_loss, loss_ref, rtol=1e-3, atol=1e-3), (all_loss, loss_ref)
    assert jnp.allclose(pred, h_ref, rtol=1e-3, atol=1e-3)

    print("KERNEL_OK")
</pallas_src>

<mosaic_0001>
module attributes {stable_mosaic.version = 11 : i64} {
  func.func @_unsup_model_kernel(%arg0: i32, %arg1: memref<1xi32, #tpu.memory_space<smem>>, %arg2: memref<128x128xf32, #tpu.memory_space<vmem>>, %arg3: memref<128x128xbf16, #tpu.memory_space<vmem>>, %arg4: memref<1x128xf32, #tpu.memory_space<vmem>>, %arg5: memref<128x128xbf16, #tpu.memory_space<vmem>>, %arg6: memref<1x128xf32, #tpu.memory_space<vmem>>, %arg7: memref<128x128xf32, #tpu.memory_space<vmem>>, %arg8: memref<1x8x128xf32, #tpu.memory_space<vmem>>) attributes {dimension_semantics = [#tpu.dimension_semantics<parallel>], iteration_bounds = array<i64: 2>, scalar_prefetch = 1 : i64, scratch_operands = 0 : i64, tpu.core_type = #tpu.core_type<tc>, window_params = [{transform_indices = @transform_0, window_bounds = array<i64: 128, 128>}, {pipeline_mode = #tpu.pipeline_mode<synchronous>, transform_indices = @transform_1, window_bounds = array<i64: 128, 128>}, {pipeline_mode = #tpu.pipeline_mode<synchronous>, transform_indices = @transform_2, window_bounds = array<i64: 1, 128>}, {pipeline_mode = #tpu.pipeline_mode<synchronous>, transform_indices = @transform_3, window_bounds = array<i64: 128, 128>}, {pipeline_mode = #tpu.pipeline_mode<synchronous>, transform_indices = @transform_4, window_bounds = array<i64: 1, 128>}, {transform_indices = @transform_5, window_bounds = array<i64: 128, 128>}, {transform_indices = @transform_6, window_bounds = array<i64: 1, 8, 128>}]} {
    %c0 = arith.constant 0 : index
    %c0_0 = arith.constant 0 : index
    %0 = vector.load %arg2[%c0, %c0_0] : memref<128x128xf32, #tpu.memory_space<vmem>>, vector<128x128xf32>
    %1 = arith.truncf %0 : vector<128x128xf32> to vector<128x128xbf16>
    %c0_1 = arith.constant 0 : index
    %c0_2 = arith.constant 0 : index
    %2 = vector.load %arg3[%c0_1, %c0_2] : memref<128x128xbf16, #tpu.memory_space<vmem>>, vector<128x128xbf16>
    %cst = arith.constant dense<0.000000e+00> : vector<128x128xf32>
    %3 = tpu.matmul %1, %2, %cst {dimension_numbers = #tpu.dot_dimension_numbers<[1], [0], [0], [1], [0, 0, 1, 1], [], []>} : vector<128x128xbf16>, vector<128x128xbf16>, vector<128x128xf32> -> vector<128x128xf32>
    %c0_3 = arith.constant 0 : index
    %c0_4 = arith.constant 0 : index
    %4 = vector.load %arg4[%c0_3, %c0_4] : memref<1x128xf32, #tpu.memory_space<vmem>>, vector<1x128xf32>
    %5 = vector.broadcast %4 : vector<1x128xf32> to vector<128x128xf32>
    %6 = arith.addf %3, %5 : vector<128x128xf32>
    %cst_5 = arith.constant 0.000000e+00 : f32
    %7 = vector.broadcast %cst_5 : f32 to vector<128x128xf32>
    %8 = arith.maximumf %6, %7 : vector<128x128xf32>
    %9 = arith.truncf %8 : vector<128x128xf32> to vector<128x128xbf16>
    %c0_6 = arith.constant 0 : index
    %c0_7 = arith.constant 0 : index
    %10 = vector.load %arg5[%c0_6, %c0_7] : memref<128x128xbf16, #tpu.memory_space<vmem>>, vector<128x128xbf16>
    %cst_8 = arith.constant dense<0.000000e+00> : vector<128x128xf32>
    %11 = tpu.matmul %9, %10, %cst_8 {dimension_numbers = #tpu.dot_dimension_numbers<[1], [0], [0], [1], [0, 0, 1, 1], [], []>} : vector<128x128xbf16>, vector<128x128xbf16>, vector<128x128xf32> -> vector<128x128xf32>
    %c0_9 = arith.constant 0 : index
    %c0_10 = arith.constant 0 : index
    %12 = vector.load %arg6[%c0_9, %c0_10] : memref<1x128xf32, #tpu.memory_space<vmem>>, vector<1x128xf32>
    %13 = vector.broadcast %12 : vector<1x128xf32> to vector<128x128xf32>
    %14 = arith.addf %11, %13 : vector<128x128xf32>
    %c128_i32 = arith.constant 128 : i32
    %15 = arith.muli %arg0, %c128_i32 : i32
    %16 = tpu.iota {dimensions = array<i32: 0>} : vector<128x1xi32>
    %17 = vector.broadcast %15 : i32 to vector<128x1xi32>
    %18 = arith.addi %16, %17 : vector<128x1xi32>
    %c0_11 = arith.constant 0 : index
    %19 = memref.load %arg1[%c0_11] : memref<1xi32, #tpu.memory_space<smem>>
    %20 = vector.broadcast %19 : i32 to vector<128x1xi32>
    %21 = arith.cmpi slt, %18, %20 : vector<128x1xi32>
    %22 = arith.extui %21 : vector<128x1xi1> to vector<128x1xi32>
    %23 = arith.sitofp %22 : vector<128x1xi32> to vector<128x1xf32>
    %24 = arith.subf %14, %0 : vector<128x128xf32>
    %25 = vector.broadcast %23 : vector<128x1xf32> to vector<128x128xf32>
    %26 = arith.mulf %24, %25 : vector<128x128xf32>
    %27 = arith.mulf %26, %26 : vector<128x128xf32>
    %cst_12 = arith.constant dense<0.000000e+00> : vector<128xf32>
    %28 = vector.multi_reduction <add>, %27, %cst_12 [0] : vector<128x128xf32> to vector<128xf32>
    %29 = vector.shape_cast %28 : vector<128xf32> to vector<1x1x128xf32>
    %30 = vector.shape_cast %29 : vector<1x1x128xf32> to vector<1x1x128xf32>
    %31 = vector.broadcast %30 : vector<1x1x128xf32> to vector<1x8x128xf32>
    %c0_13 = arith.constant 0 : index
    %c0_14 = arith.constant 0 : index
    %c0_15 = arith.constant 0 : index
    %32 = vector.load %arg8[%c0_13, %c0_14, %c0_15] : memref<1x8x128xf32, #tpu.memory_space<vmem>>, vector<1x8x128xf32>
    tpu.vector_store %arg8[%c0_13, %c0_14, %c0_15], %31 {strides = array<i32>} : memref<1x8x128xf32, #tpu.memory_space<vmem>>, vector<1x8x128xf32>,
    %c0_16 = arith.constant 0 : index
    %c0_17 = arith.constant 0 : index
    %33 = vector.load %arg7[%c0_16, %c0_17] : memref<128x128xf32, #tpu.memory_space<vmem>>, vector<128x128xf32>
    tpu.vector_store %arg7[%c0_16, %c0_17], %8 {strides = array<i32>} : memref<128x128xf32, #tpu.memory_space<vmem>>, vector<128x128xf32>,
    return
  }
  func.func @transform_0(%arg0: i32, %arg1: memref<1xi32, #tpu.memory_space<smem>>) -> (i32, i32) {
    %c0_i32 = arith.constant 0 : i32
    %c0_i32_0 = arith.constant 0 : i32
    return %arg0, %c0_i32 : i32, i32
  }
  func.func @transform_1(%arg0: i32, %arg1: memref<1xi32, #tpu.memory_space<smem>>) -> (i32, i32) {
    %c0_i32 = arith.constant 0 : i32
    %c0_i32_0 = arith.constant 0 : i32
    %c0_i32_1 = arith.constant 0 : i32
    return %c0_i32, %c0_i32_0 : i32, i32
  }
  func.func @transform_2(%arg0: i32, %arg1: memref<1xi32, #tpu.memory_space<smem>>) -> (i32, i32) {
    %c0_i32 = arith.constant 0 : i32
    %c0_i32_0 = arith.constant 0 : i32
    %c0_i32_1 = arith.constant 0 : i32
    return %c0_i32, %c0_i32_0 : i32, i32
  }
  func.func @transform_3(%arg0: i32, %arg1: memref<1xi32, #tpu.memory_space<smem>>) -> (i32, i32) {
    %c0_i32 = arith.constant 0 : i32
    %c0_i32_0 = arith.constant 0 : i32
    %c0_i32_1 = arith.constant 0 : i32
    return %c0_i32, %c0_i32_0 : i32, i32
  }
  func.func @transform_4(%arg0: i32, %arg1: memref<1xi32, #tpu.memory_space<smem>>) -> (i32, i32) {
    %c0_i32 = arith.constant 0 : i32
    %c0_i32_0 = arith.constant 0 : i32
    %c0_i32_1 = arith.constant 0 : i32
    return %c0_i32, %c0_i32_0 : i32, i32
  }
  func.func @transform_5(%arg0: i32, %arg1: memref<1xi32, #tpu.memory_space<smem>>) -> (i32, i32) {
    %c0_i32 = arith.constant 0 : i32
    %c0_i32_0 = arith.constant 0 : i32
    return %arg0, %c0_i32 : i32, i32
  }
  func.func @transform_6(%arg0: i32, %arg1: memref<1xi32, #tpu.memory_space<smem>>) -> (i32, i32, i32) {
    %c0_i32 = arith.constant 0 : i32
    %c0_i32_0 = arith.constant 0 : i32
    %c0_i32_1 = arith.constant 0 : i32
    return %arg0, %c0_i32, %c0_i32_0 : i32, i32, i32
  }
}

</mosaic_0001>

<bundles_post_ra>
// kernel: tpu_custom_call.1
= control target key start
LH: loop header
LB: loop body
LE: loop exit
PB: predicated region body
PF: predicated region fallthrough
CT: control target
= control target key end

     0   :  { %s2020_s0 = inlined_call_operand.<no memory space> [shape: s32[1], index: 0, kind: input, shape index: {}]   ;;  %s2021_s1 = inlined_call_operand.hbm [shape: f32[256,128], index: 1, kind: input, shape index: {}]   ;;  %s2022_s2 = inlined_call_operand.hbm [shape: bf16[128,128], index: 2, kind: input, shape index: {}]   ;;  %s2023_s3 = inlined_call_operand.vmem [shape: f32[1,128], index: 3, kind: input, shape index: {}]   ;;  %s2024_s4 = inlined_call_operand.hbm [shape: bf16[128,128], index: 4, kind: input, shape index: {}]   ;;  %s2025_s5 = inlined_call_operand.vmem [shape: f32[1,128], index: 5, kind: input, shape index: {}]   ;;  %s2026_s6 = inlined_call_operand.hbm [shape: f32[256,128], index: 6, kind: output, shape index: {0}]   ;;  %s2027_s7 = inlined_call_operand.hbm [shape: f32[2,8,128], index: 7, kind: output, shape index: {1}]  }
   0x1   :  { %13 = sst [smem:[#allocation3]] %s2020_s0 }
   0x2   :  { %14 = vsyncpa [#allocation5], 0 }
   0x3   :  { %16 = vsyncpa [#allocation5 + $0x1], 0 }
   0x4   :  { %17 = vsyncpa [#allocation8], 0 }
   0x5   :  { %18 = vsyncpa [#allocation6], 0 }
   0x6   :  { %20 = vsyncpa [#allocation6 + $0x1], 0 }
   0x7   :  { %21 = vsyncpa [#allocation12], 0 }
   0x8   :  { %23 = vsyncpa [#allocation12 + $0x1], 0  ;;  %s1520_s26 = smov 0   ;;  %s1522_s27 = smov 0  }
   0x9   :  { %s1524_s28 = smov 0   ;;  %s1526_s29 = smov 0  }
   0xa LB: > { %s1541_s0 = sadd.s32 4294967295, %s1463_s29   ;;  %s1026_s30 = sadd.s32 4294967294, %s1463_s29   ;;  %s1463_s29 = sphi %s1526_s29, %s2047_s29   ;;  %s1459_s28 = sphi %s1524_s28, %s2046_s28   ;;  %s1455_s27 = sphi %s1522_s27, %s2045_s27   ;;  %s1451_s26 = sphi %s1520_s26, %s2044_s26  }
   0xb   : > { %p49_p0 = scmp.ne.s32.totalorder %s1455_s27, %s1451_s26  ;;  %p2028_p1 = scmp.eq.s32.totalorder %s1541_s0, 0 }
   0xc   : > { %p163_p3 = scmp.eq.s32.totalorder %s1026_s30, 1  ;;  %p1027_p5 = scmp.ge.s32.totalorder %s1463_s29, 1 }
   0xd   : > { %p1550_p4 = por %p2028_p1, %p49_p0  ;;  %p196_p7 = scmp.lt.s32.totalorder %s1463_s29, 3 }
   0xe   : > { %p1555_p6 = por %p163_p3, %p49_p0  ;;  %s1465_s11 = smov [#allocation7]  }
   0xf   : > { %s2031_s8 = scalar_select %p1550_p4, 1, 0 }
  0x10   : > { %s2032_s9 = scalar_select %p1555_p6, 1, 0 }
  0x11   : > { %p1560_p8 = pnand %p1027_p5, %p196_p7  ;;  %s208_s12 = sshll.u32 %s1465_s11, 4  ;;  %s1564_s12 = int_to_ptr.vmem [resolvable:$true] %s208_s12 }
  0x12   : > { %s1466_s14 = smov [#allocation9]   ;;  %s1275_s18 = scalar_lea.hbm %s2022_s2, 1024 }
  0x13   : > { %p1194_p9 = pneg %p1560_p8  ;;  %s224_s15 = sshll.u32 %s1466_s14, 4  ;;  %s1575_s15 = int_to_ptr.vmem [resolvable:$true] %s224_s15 }
  0x14   : > { %p1276_p12 = scmp.ne.s32.totalorder %s2022_s2, %s1275_s18  ;;  %p1282_p5 = scmp.lt.u32.totalorder %s1275_s18, %s2022_s2 }
  0x15   : > { %p1571_p11 = pnand %p1194_p9, %p2028_p1 }
  0x17   : > { %p1277_p13 = pneg %p1571_p11 }
  0x19   : > { %p1278_p0 = pnand %p1277_p13, %p1276_p12 }
  0x1b   : > { %p1279_p3 = pneg %p1278_p0 }
  0x1d   : > { %p1284_p7 = pnand %p1282_p5, %p1279_p3 }
  0x1f   : > { %1287 = shalt.err (!%p1284_p7)
}
  0x20   : > { %s1288_s23 = scalar_lea.vmem %s1564_s12, 1024  ;;  %p1296_p2 = scmp.lt.s32.totalorder %s1564_s12, %s1564_s12 }
  0x21   : > { %p1289_p9 = scmp.ne.s32.totalorder %s1564_s12, %s1288_s23  ;;  %p1297_p12 = scmp.lt.s32.totalorder %s1288_s23, %s1288_s23 }
  0x23   : > { %p1291_p10 = pnand %p1289_p9, %p1277_p13  ;;  %p1298_p0 = por %p1297_p12, %p1296_p2 }
  0x25   : > { %p1292_p1 = pneg %p1291_p10 }
  0x27   : > { %p1299_p6 = pnand %p1298_p0, %p1292_p1 }
  0x29   : > { %1302 = shalt.err (!%p1299_p6)
}
  0x2a   : > { %s1467_s24 = smov 64   ;;  %s1468_s25 = smov 4  }
  0x2b   : > { %1197 = dma.hbm_to_vmem [thread:$0]  (!%p1571_p11), %s2022_s2, 1024, %s1564_s12, [#allocation8], %s1467_s24, %s1467_s24, %s1468_s25  }
  0x2c   : > { %s1303_s17 = scalar_lea.hbm %s2024_s4, 1024 }
  0x2d   : > { %p1304_p2 = scmp.ne.s32.totalorder %s2024_s4, %s1303_s17  ;;  %p1310_p10 = scmp.lt.u32.totalorder %s1303_s17, %s2024_s4 }
  0x2f   : > { %p1306_p1 = pnand %p1304_p2, %p1277_p13 }
  0x31   : > { %p1307_p6 = pneg %p1306_p1 }
  0x33   : > { %p1312_p3 = pnand %p1310_p10, %p1307_p6 }
  0x35   : > { %1315 = shalt.err (!%p1312_p3)
}
  0x36   : > { %s1316_s12 = scalar_lea.vmem %s1575_s15, 1024  ;;  %p1324_p12 = scmp.lt.s32.totalorder %s1575_s15, %s1575_s15 }
  0x37   : > { %p1317_p5 = scmp.ne.s32.totalorder %s1575_s15, %s1316_s12  ;;  %p1325_p0 = scmp.lt.s32.totalorder %s1316_s12, %s1316_s12 }
  0x39   : > { %p1319_p7 = pnand %p1317_p5, %p1277_p13  ;;  %p1326_p2 = por %p1325_p0, %p1324_p12 }
  0x3b   : > { %p1320_p9 = pneg %p1319_p7 }
  0x3d   : > { %p1327_p1 = pnand %p1326_p2, %p1320_p9 }
  0x3f   : > { %1330 = shalt.err (!%p1327_p1)
}
  0x40   : > { %1200 = dma.hbm_to_vmem [thread:$0]  (!%p1571_p11), %s2024_s4, 1024, %s1575_s15, [#allocation8], %s1467_s24, %s1467_s24, %s1468_s25  }
  0x41   : > { %s1630_s30 = sadd.s32 1, %s1463_s29   ;;  %s36_s13 = sadd.s32 1, %s1459_s28 }
  0x42   : > { %s33_s11 = ssub.s32 %s1463_s29, %s1630_s30  ;;  %p43_p13 = scmp.ne.s32.totalorder %s1459_s28, %s1455_s27 }
  0x43   : > { %p34_p6 = scmp.eq.s32.totalorder %s33_s11, 0  ;;  %p44_p10 = scmp.eq.s32.totalorder %s1463_s29, 0 }
  0x44   : > { %p2035_p3 = scmp.eq.s32.totalorder %s1541_s0, 1  ;;  %p1214_p7 = scmp.lt.s32.totalorder %s1463_s29, 2 }
  0x45   : > { %s1646_s16 = scalar_select %p34_p6, %s1459_s28, %s36_s13  }
  0x46   : > { %p1640_p5 = por %p2035_p3, %p43_p13  ;;  %p45_p9 = por %p44_p10, %p43_p13 }
  0x47   : > { %s241_s17 = sand.u32 1, %s1459_s28   ;;  %s1082_s15 = sshll.u32 %s1463_s29, 11 }
  0x48   : > { %s2036_s14 = scalar_select %p1640_p5, 1, 0 }
  0x49   : > { %s1031_s18 = sshll.u32 %s241_s17, 7  ;;  %s1653_s19 = scalar_lea.hbm %s2021_s1, %s1082_s15 }
  0x4a   : > { %s245_s20 = scalar_lea.vmem [#allocation4], %s1031_s18  ;;  %p1657_p11 = pnand %p1214_p7, %p45_p9 }
  0x4b   : > { %s252_s21 = sshll.u32 %s245_s20, 4  ;;  %s1661_s22 = scalar_lea.sflag [#allocation5], %s241_s17  ;;  %s1655_s21 = int_to_ptr.vmem [resolvable:$true] %s252_s21 }
  0x4c   : > { %s1331_s23 = scalar_lea.hbm %s1653_s19, 2048  ;;  %p1333_p0 = pneg %p1657_p11 }
  0x4d   : > { %p1332_p12 = scmp.ne.s32.totalorder %s1653_s19, %s1331_s23  ;;  %s1336_s18 = scalar_lea.hbm %s2021_s1, 4096 }
  0x4e   : > { %p1337_p13 = scmp.lt.u32.totalorder %s1653_s19, %s2021_s1  ;;  %p1338_p6 = scmp.lt.u32.totalorder %s1336_s18, %s1331_s23 }
  0x4f   : > { %p1334_p2 = pnand %p1333_p0, %p1332_p12  ;;  %p1340_p3 = scmp.lt.u32.totalorder %s1331_s23, %s1653_s19 }
  0x50   : > { %p1339_p10 = por %p1338_p6, %p1337_p13 }
  0x51   : > { %p1335_p1 = pneg %p1334_p2 }
  0x52   : > { %p1341_p7 = por %p1340_p3, %p1339_p10 }
  0x54   : > { %p1342_p9 = pnand %p1341_p7, %p1335_p1 }
  0x56   : > { %1345 = shalt.err (!%p1342_p9)
}
  0x57   : > { %s1346_s17 = scalar_lea.vmem %s1655_s21, 2048  ;;  %s1469_s25 = smov [#allocation4]  }
  0x58   : > { %p1347_p12 = scmp.ne.s32.totalorder %s1655_s21, %s1346_s17  ;;  %s1351_s20 = sshll.u32 %s1469_s25, 4  ;;  %s1352_s20 = int_to_ptr.vmem [resolvable:$false] %s1351_s20 }
  0x59   : > { %s1353_s13 = scalar_lea.vmem %s1352_s20, 4096  ;;  %p1354_p4 = scmp.lt.s32.totalorder %s1655_s21, %s1352_s20 }
  0x5a   : > { %p1349_p2 = pnand %p1347_p12, %p1333_p0  ;;  %p1355_p13 = scmp.lt.s32.totalorder %s1353_s13, %s1346_s17 }
  0x5c   : > { %p1350_p5 = pneg %p1349_p2  ;;  %p1356_p6 = por %p1355_p13, %p1354_p4 }
  0x5e   : > { %p1357_p10 = pnand %p1356_p6, %p1350_p5 }
  0x60   : > { %1360 = shalt.err (!%p1357_p10)
}
  0x61   : > { %s1470_s23 = smov 128   ;;  %s1471_s11 = smov 8  }
  0x62   : > { %1204 = dma.hbm_to_vmem [thread:$0]  (!%p1657_p11), %s1653_s19, 2048, %s1655_s21, %s1661_s22, %s1470_s23, %s1470_s23, %s1471_s11  }
  0x63   : > { %264 = sbr.rel (%p1560_p8) target bundleno = 644 (0x284), region = 40  ;;  %s1692_s18 = sand.u32 (!%p1560_p8), 1, %s1455_s27  }
  0x64   : > { %s1035_s15 = sshll.u32 (!%p1560_p8), %s1692_s18, 7  ;;  %s267_s24 = scalar_lea.sflag (!%p1560_p8), [#allocation5], %s1692_s18 }
  0x65   : > { %s1698_s17 = scalar_lea.vmem (!%p1560_p8), [#allocation4], %s1035_s15  ;;  %p2038_p4 = scmp.ne.s32.totalorder (!%p1560_p8), %s2031_s8, 0 }
  0x6a   : > { %1434 = dma.done.wait (%p2038_p4), %s267_s24, 2048  }
  0x6b   : > { %1436 = vsyncadd (%p2038_p4), %s267_s24, 4294965248  ;;  %p2039_p5 = scmp.eq.s32.totalorder %s1541_s0, 0 }
  0x6d   : > { %1438 = dma.done.wait (%p2039_p5), [#allocation8], 2048   ;;  %p2040_p8 = pmov %p2039_p5 }
  0x6e   : > { %v1259_v0 = vld [vmem:[#allocation7] sm:$0xff]   ;;  %v1260_v1 = vld [vmem:[#allocation7 + $0x8] sm:$0xff]   ;;  %v1261_v2 = vld [vmem:[#allocation7 + $0x10] sm:$0xff]   ;;  %s1783_s19 = scalar_lea.vmem [#allocation10], %s1035_s15  ;;  %s1083_s21 = sshll.u32 %s1541_s0, 11 }
  0x6f   : > { %1440 = vsyncadd (%p2040_p8), [#allocation8], 4294965248  ;;  %1116 = vmatprep.subr.bf16.mxu0 %v1259_v0  ;;  %v1262_v3 = vld [vmem:[#allocation7 + $0x18] sm:$0xff]   ;;  %v1709_v4 = vld [vmem:[%s1698_s17] sm:$0xff]  ;;  %s1817_s25 = scalar_lea.hbm %s2026_s6, %s1083_s21  ;;  %s889_s20 = sshll.u32 %s1783_s19, 4  ;;  %s1820_s20 = int_to_ptr.vmem [resolvable:$true] %s889_s20 }
  0x70   : > { %1117 = vmatpush3.bf16.msra.mxu0 %v1259_v0  ;;  %v1712_v5 = vld [vmem:[%s1698_s17 + $0x8] sm:$0xff]  ;;  %v1263_v7 = vld [vmem:[#allocation7 + $0x20] sm:$0xff]   ;;  %v1269_v11 = vld [vmem:[#allocation9 + $0x10] sm:$0xff]   ;;  %s871_s13 = scalar_lea.sflag [#allocation6], %s1692_s18  ;;  %s1361_s23 = scalar_lea.vmem %s1820_s20, 2048 }
  0x71   : > { %1118 = vmatprep.subr.bf16.mxu0 %v1260_v1  ;;  %v331_v6 = vpack.c.bf16 %v1712_v5, %v1709_v4  ;;  %v1267_v8 = vld [vmem:[#allocation9] sm:$0xff]   ;;  %v1268_v9 = vld [vmem:[#allocation9 + $0x8] sm:$0xff]   ;;  %v1265_v12 = vld [vmem:[#allocation7 + $0x30] sm:$0xff]   ;;  %p1362_p11 = scmp.ne.s32.totalorder %s1820_s20, %s1361_s23  ;;  %p2041_p0 = scmp.ne.s32.totalorder %s2036_s14, 0 }
  0x72   : > { %v1264_v10 = vld [vmem:[#allocation7 + $0x28] sm:$0xff]   ;;  %1148 = vmatprep.subr.bf16.mxu1 %v1267_v8  ;;  %v1270_v13 = vld [vmem:[#allocation9 + $0x18] sm:$0xff]   ;;  %v1271_v15 = vld [vmem:[#allocation9 + $0x20] sm:$0xff]   ;;  %s1472_s11 = smov [#allocation10]  }
  0x73   : > { %1132 = vmatprep.mubr.bf16.mxu0 %v331_v6  ;;  %1149 = vmatpush3.bf16.msra.mxu1 %v1267_v8  ;;  %v1266_v14 = vld [vmem:[#allocation7 + $0x38] sm:$0xff]   ;;  %v1717_v16 = vld [vmem:[%s1698_s17 + $0x10] sm:$0xff]  ;;  %v1723_v18 = vld [vmem:[%s1698_s17 + $0x20] sm:$0xff]  ;;  %p1363_p1 = pnand %p1362_p11, %p2041_p0  ;;  %s1365_s15 = sshll.u32 %s1472_s11, 4  ;;  %s1366_s15 = int_to_ptr.vmem [resolvable:$false] %s1365_s15 }
  0x74   : > { %1119 = vmatpush3.bf16.msra.mxu0 %v1260_v1  ;;  %1150 = vmatprep.subr.bf16.mxu1 %v1268_v9  ;;  %v1720_v17 = vld [vmem:[%s1698_s17 + $0x18] sm:$0xff]  ;;  %v1726_v19 = vld [vmem:[%s1698_s17 + $0x28] sm:$0xff]  ;;  %v1733_v23 = vld [vmem:[%s1698_s17 + $0x30] sm:$0xff]  ;;  %s1367_s24 = scalar_lea.vmem %s1366_s15, 4096  ;;  %p1368_p7 = scmp.lt.s32.totalorder %s1820_s20, %s1366_s15 }
  0x75   : > { %1120 = vmatprep.subr.bf16.mxu0 %v1261_v2  ;;  %v332_v20 = vpack.c.bf16 %v1720_v17, %v1717_v16  ;;  %v1272_v21 = vld [vmem:[#allocation9 + $0x28] sm:$0xff]   ;;  %v333_v22 = vpack.c.bf16 %v1726_v19, %v1723_v18  ;;  %v1736_v24 = vld [vmem:[%s1698_s17 + $0x38] sm:$0xff]  ;;  %v1739_v25 = vld [vmem:[%s1698_s17 + $0x40] sm:$0xff]  ;;  %p1364_p3 = pneg %p1363_p1  ;;  %p1369_p9 = scmp.lt.s32.totalorder %s1367_s24, %s1361_s23 }
  0x76   : > { %v1742_v26 = vld [vmem:[%s1698_s17 + $0x48] sm:$0xff]  ;;  %v334_v27 = vpack.c.bf16 %v1736_v24, %v1733_v23  ;;  %v1749_v29 = vld [vmem:[%s1698_s17 + $0x50] sm:$0xff]  ;;  %v1752_v30 = vld [vmem:[%s1698_s17 + $0x58] sm:$0xff] }
  0x77   : > { %1151 = vmatpush3.bf16.msra.mxu1 %v1268_v9  ;;  %v335_v28 = vpack.c.bf16 %v1742_v26, %v1739_v25  ;;  %v1755_v31 = vld [vmem:[%s1698_s17 + $0x60] sm:$0xff]  ;;  %v1758_v32 = vld [vmem:[%s1698_s17 + $0x68] sm:$0xff]  ;;  %v336_v33 = vpack.c.bf16 %v1752_v30, %v1749_v29  ;;  %v1765_v35 = vld [vmem:[%s1698_s17 + $0x70] sm:$0xff]  ;;  %p1370_p12 = por %p1369_p9, %p1368_p7 }
  0x78   : > { %1121 = vmatpush3.bf16.msra.mxu0 %v1261_v2  ;;  %1152 = vmatprep.subr.bf16.mxu1 %v1269_v11  ;;  %v337_v34 = vpack.c.bf16 %v1758_v32, %v1755_v31  ;;  %v1768_v36 = vld [vmem:[%s1698_s17 + $0x78] sm:$0xff]  ;;  %v1273_v38 = vld [vmem:[#allocation9 + $0x30] sm:$0xff]   ;;  %v1775_v40 = vld [vmem:[%s2023_s3] ss:$0 sm:$0xff] }
  0x79   : > { %1122 = vmatprep.subr.bf16.mxu0 %v1262_v3  ;;  %v338_v37 = vpack.c.bf16 %v1768_v36, %v1765_v35  ;;  %v1274_v39 = vld [vmem:[#allocation9 + $0x38] sm:$0xff]   ;;  %p1371_p2 = pnand %p1370_p12, %p1364_p3 }
  0x7b   : > { %1153 = vmatpush3.bf16.msra.mxu1 %v1269_v11 }
  0x7c   : > { %1123 = vmatpush3.bf16.msra.mxu0 %v1262_v3  ;;  %1154 = vmatprep.subr.bf16.mxu1 %v1270_v13 }
  0x7d   : > { %1124 = vmatprep.subr.bf16.mxu0 %v1263_v7 }
  0x7f   : > { %1155 = vmatpush3.bf16.msra.mxu1 %v1270_v13 }
  0x80   : > { %1125 = vmatpush3.bf16.msra.mxu0 %v1263_v7  ;;  %1156 = vmatprep.subr.bf16.mxu1 %v1271_v15 }
  0x81   : > { %1126 = vmatprep.subr.bf16.mxu0 %v1264_v10 }
  0x83   : > { %1157 = vmatpush3.bf16.msra.mxu1 %v1271_v15 }
  0x84   : > { %1127 = vmatpush3.bf16.msra.mxu0 %v1264_v10  ;;  %1158 = vmatprep.subr.bf16.mxu1 %v1272_v21 }
  0x85   : > { %1128 = vmatprep.subr.bf16.mxu0 %v1265_v12 }
  0x87   : > { %1159 = vmatpush3.bf16.msra.mxu1 %v1272_v21 }
  0x88   : > { %1129 = vmatpush3.bf16.msra.mxu0 %v1265_v12  ;;  %1160 = vmatprep.subr.bf16.mxu1 %v1273_v38 }
  0x89   : > { %1130 = vmatprep.subr.bf16.mxu0 %v1266_v14 }
  0x8b   : > { %1161 = vmatpush3.bf16.msra.mxu1 %v1273_v38 }
  0x8c   : > { %1131 = vmatpush3.bf16.msra.mxu0 %v1266_v14  ;;  %1162 = vmatprep.subr.bf16.mxu1 %v1274_v39 }
  0x8f   : > { %1133 = vmatmul.mubr.bf16.vlgmr.msra.gmra.mrb[0].mxu0 %v332_v20  ;;  %1163 = vmatpush3.bf16.msra.mxu1 %v1274_v39 }
  0x90   : > { %1136 = vmatprep.mubr.bf16.mxu0 %v333_v22 }
  0x97   : > { %1137 = vmatmul.mubr.bf16.gmra.mrb[4].mxu0 %v334_v27 }
  0x98   : > { %1140 = vmatprep.mubr.bf16.mxu0 %v335_v28 }
  0x9f   : > { %1141 = vmatmul.mubr.bf16.gmra.mrb[8].mxu0 %v336_v33 }
  0xa0   : > { %1144 = vmatprep.mubr.bf16.mxu0 %v337_v34 }
  0xa7   : > { %1145 = vmatmul.mubr.bf16.gmra.mrb[12].mxu0 %v338_v37 }
 0x162   : > { %v1134_v41 = vpop.f32.mrb[0].mxu0 }
 0x163   : > { %v453_v42 = vadd.f32 %v1134_v41, %v1775_v40  ;;  %v444_v43 = vpop.f32.mrb[1].mxu0 }
 0x164   : > { %v445_v44 = vadd.f32 %v1775_v40, %v444_v43  ;;  %v1135_v45 = vpop.f32.mrb[2].mxu0 }
 0x165   : > { %v509_v46 = vmax.f32 %v453_v42, 0.0  ;;  %v456_v47 = vadd.f32 %v1135_v45, %v1775_v40  ;;  %v447_v48 = vpop.f32.mrb[3].mxu0 }
 0x166   : > { %v507_v49 = vmax.f32 %v445_v44, 0.0  ;;  %v448_v50 = vadd.f32 %v1775_v40, %v447_v48 }
 0x167   : > { %856 = vst [vmem:[%s1783_s19 + $0x10] sm:$0xff] %v509_v46  ;;  %v510_v51 = vmax.f32 %v456_v47, 0.0 }
 0x168   : > { %854 = vst [vmem:[%s1783_s19] sm:$0xff] %v507_v49  ;;  %v508_v52 = vmax.f32 %v448_v50, 0.0 }
 0x169   : > { %v524_v53 = vpack.c.bf16 %v510_v51, %v509_v46  ;;  %857 = vst [vmem:[%s1783_s19 + $0x18] sm:$0xff] %v510_v51 }
 0x16a   : > { %855 = vst [vmem:[%s1783_s19 + $0x8] sm:$0xff] %v508_v52  ;;  %v1138_v54 = vpop.f32.mrb[4].mxu0  ;;  %v523_v55 = vpack.c.bf16 %v508_v52, %v507_v49 }
 0x16b   : > { %v469_v56 = vadd.f32 %v1138_v54, %v1775_v40  ;;  %v460_v57 = vpop.f32.mrb[5].mxu0 }
 0x16c   : > { %v461_v58 = vadd.f32 %v1775_v40, %v460_v57  ;;  %v1139_v59 = vpop.f32.mrb[6].mxu0  ;;  %1164 = vmatprep.mubr.bf16.mxu1 %v523_v55 }
 0x16d   : > { %v513_v60 = vmax.f32 %v469_v56, 0.0  ;;  %v472_v61 = vadd.f32 %v1139_v59, %v1775_v40  ;;  %v463_v62 = vpop.f32.mrb[7].mxu0  ;;  %1165 = vmatmul.mubr.bf16.vlgmr.msra.gmra.mrb[0].mxu1 %v524_v53 }
 0x16e   : > { %v511_v63 = vmax.f32 %v461_v58, 0.0  ;;  %v464_v0 = vadd.f32 %v1775_v40, %v463_v62 }
 0x16f   : > { %860 = vst [vmem:[%s1783_s19 + $0x30] sm:$0xff] %v513_v60  ;;  %v514_v1 = vmax.f32 %v472_v61, 0.0 }
 0x170   : > { %858 = vst [vmem:[%s1783_s19 + $0x20] sm:$0xff] %v511_v63  ;;  %v512_v2 = vmax.f32 %v464_v0, 0.0 }
 0x171   : > { %v526_v3 = vpack.c.bf16 %v514_v1, %v513_v60  ;;  %861 = vst [vmem:[%s1783_s19 + $0x38] sm:$0xff] %v514_v1 }
 0x172   : > { %v525_v6 = vpack.c.bf16 %v512_v2, %v511_v63  ;;  %859 = vst [vmem:[%s1783_s19 + $0x28] sm:$0xff] %v512_v2  ;;  %v1142_v7 = vpop.f32.mrb[8].mxu0 }
 0x173   : > { %v485_v8 = vadd.f32 %v1142_v7, %v1775_v40  ;;  %v476_v9 = vpop.f32.mrb[9].mxu0 }
 0x174   : > { %v477_v10 = vadd.f32 %v1775_v40, %v476_v9  ;;  %v1143_v11 = vpop.f32.mrb[10].mxu0  ;;  %1168 = vmatprep.mubr.bf16.mxu1 %v525_v6 }
 0x175   : > { %v517_v12 = vmax.f32 %v485_v8, 0.0  ;;  %v488_v13 = vadd.f32 %v1143_v11, %v1775_v40  ;;  %v479_v14 = vpop.f32.mrb[11].mxu0  ;;  %1169 = vmatmul.mubr.bf16.gmra.mrb[4].mxu1 %v526_v3 }
 0x176   : > { %v515_v15 = vmax.f32 %v477_v10, 0.0  ;;  %v480_v20 = vadd.f32 %v1775_v40, %v479_v14 }
 0x177   : > { %864 = vst [vmem:[%s1783_s19 + $0x50] sm:$0xff] %v517_v12  ;;  %v518_v21 = vmax.f32 %v488_v13, 0.0 }
 0x178   : > { %862 = vst [vmem:[%s1783_s19 + $0x40] sm:$0xff] %v515_v15  ;;  %v516_v22 = vmax.f32 %v480_v20, 0.0 }
 0x179   : > { %v528_v27 = vpack.c.bf16 %v518_v21, %v517_v12  ;;  %865 = vst [vmem:[%s1783_s19 + $0x58] sm:$0xff] %v518_v21 }
 0x17a   : > { %v527_v28 = vpack.c.bf16 %v516_v22, %v515_v15  ;;  %863 = vst [vmem:[%s1783_s19 + $0x48] sm:$0xff] %v516_v22  ;;  %v1146_v33 = vpop.f32.mrb[12].mxu0 }
 0x17b   : > { %v501_v34 = vadd.f32 %v1146_v33, %v1775_v40  ;;  %v492_v37 = vpop.f32.mrb[13].mxu0 }
 0x17c   : > { %v493_v38 = vadd.f32 %v1775_v40, %v492_v37  ;;  %v1147_v39 = vpop.f32.mrb[14].mxu0  ;;  %1172 = vmatprep.mubr.bf16.mxu1 %v527_v28 }
 0x17d   : > { %v521_v41 = vmax.f32 %v501_v34, 0.0  ;;  %v504_v42 = vadd.f32 %v1147_v39, %v1775_v40  ;;  %v495_v43 = vpop.f32.mrb[15].mxu0  ;;  %1173 = vmatmul.mubr.bf16.gmra.mrb[8].mxu1 %v528_v27 }
 0x17e   : > { %v519_v44 = vmax.f32 %v493_v38, 0.0  ;;  %v496_v45 = vadd.f32 %v1775_v40, %v495_v43 }
 0x17f   : > { %868 = vst [vmem:[%s1783_s19 + $0x70] sm:$0xff] %v521_v41  ;;  %v522_v46 = vmax.f32 %v504_v42, 0.0 }
 0x180   : > { %866 = vst [vmem:[%s1783_s19 + $0x60] sm:$0xff] %v519_v44  ;;  %v520_v47 = vmax.f32 %v496_v45, 0.0 }
 0x181   : > { %v530_v48 = vpack.c.bf16 %v522_v46, %v521_v41  ;;  %869 = vst [vmem:[%s1783_s19 + $0x78] sm:$0xff] %v522_v46 }
 0x182   : > { %v529_v49 = vpack.c.bf16 %v520_v47, %v519_v44  ;;  %867 = vst [vmem:[%s1783_s19 + $0x68] sm:$0xff] %v520_v47 }
 0x184   : > { %1176 = vmatprep.mubr.bf16.mxu1 %v529_v49 }
 0x185   : > { %1177 = vmatmul.mubr.bf16.gmra.mrb[12].mxu1 %v530_v48 }
 0x186   : > { %1374 = shalt.err (!%p1371_p2)
}
 0x187   : > { %s1375_s17 = scalar_lea.hbm %s1817_s25, 2048  ;;  %s1379_s19 = scalar_lea.hbm %s2026_s6, 4096 }
 0x188   : > { %p1376_p13 = scmp.ne.s32.totalorder %s1817_s25, %s1375_s17  ;;  %p1380_p4 = scmp.lt.u32.totalorder %s1817_s25, %s2026_s6 }
 0x189   : > { %p1381_p5 = scmp.lt.u32.totalorder %s1379_s19, %s1375_s17  ;;  %p1383_p11 = scmp.lt.u32.totalorder %s1375_s17, %s1817_s25 }
 0x18a   : > { %p1377_p6 = pnand %p1376_p13, %p2041_p0 }
 0x18b   : > { %p1382_p8 = por %p1381_p5, %p1380_p4 }
 0x18c   : > { %p1378_p10 = pneg %p1377_p6 }
 0x18d   : > { %p1384_p1 = por %p1383_p11, %p1382_p8 }
 0x18f   : > { %p1385_p3 = pnand %p1384_p1, %p1378_p10 }
 0x191   : > { %1388 = shalt.err (!%p1385_p3)
}
 0x192   : > { %s1473_s22 = smov 128   ;;  %s1474_s23 = smov 8   ;;  %v700_v40 = vlaneseq  ;;  %v1868_v61 = vld [vmem:[%s2025_s5] ss:$0 sm:$0xff]  ;;  %v1475_v0 = vmov 0.0  }
 0x193   : > { %1190 = dma.vmem_to_hbm [thread:$0]  (%p2041_p0), %s1820_s20, 2048, %s1817_s25, %s871_s13, %s1473_s22, %s1473_s22, %s1474_s23  }
 0x194   : > { %v1846_v50 = vshrl.u32 %v700_v40, 7  ;;  %s734_s11 = sld [smem:[#allocation3]]  ;;  %s1058_s15 = sshll.u32 %s1541_s0, 7 }
 0x195   : > { %v1852_v52 = vstv %s1058_s15  ;;  %s1039_s13 = sshll.u32 %s1692_s18, 3  ;;  %s1976_s19 = scalar_lea.hbm %s2027_s7, %s1058_s15 }
 0x196   : > { %v703_v51 = vadd.s32 16, %v1846_v50  ;;  %v702_v53 = vadd.s32 8, %v1846_v50  ;;  %v704_v56 = vadd.s32 24, %v1846_v50  ;;  %v718_v57 = vadd.s32 %v1852_v52, %v1846_v50  ;;  %s311_s24 = scalar_lea.vmem [#allocation11], %s1039_s13  ;;  %s876_s21 = scalar_lea.sflag [#allocation12], %s1692_s18 }
 0x197   : > { %v707_v59 = vadd.s32 48, %v1846_v50  ;;  %v705_v60 = vadd.s32 32, %v1846_v50  ;;  %v708_v2 = vadd.s32 56, %v1846_v50  ;;  %v706_v9 = vadd.s32 40, %v1846_v50  ;;  %s905_s17 = sshll.u32 %s311_s24, 4  ;;  %s1476_s22 = smov [#allocation11]   ;;  %s1978_s17 = int_to_ptr.vmem [resolvable:$true] %s905_s17 }
 0x198   : > { %v720_v54 = vadd.s32 %v1852_v52, %v703_v51  ;;  %v719_v58 = vadd.s32 %v1852_v52, %v702_v53  ;;  %v721_v62 = vadd.s32 %v1852_v52, %v704_v56  ;;  %v711_v13 = vadd.s32 80, %v1846_v50  ;;  %s1389_s12 = scalar_lea.vmem %s1978_s17, 128  ;;  %s1393_s23 = sshll.u32 %s1476_s22, 4  ;;  %s1394_s23 = int_to_ptr.vmem [resolvable:$false] %s1393_s23 }
 0x199   : > { %v724_v7 = vadd.s32 %v1852_v52, %v707_v59  ;;  %v722_v8 = vadd.s32 %v1852_v52, %v705_v60  ;;  %v709_v21 = vadd.s32 64, %v1846_v50  ;;  %v712_v22 = vadd.s32 88, %v1846_v50  ;;  %p1390_p7 = scmp.ne.s32.totalorder %s1978_s17, %s1389_s12  ;;  %s1395_s0 = scalar_lea.vmem %s1394_s23, 256 }
 0x19a   : > { %v1856_v55 = vstv %s734_s11  ;;  %v725_v34 = vadd.s32 %v1852_v52, %v708_v2  ;;  %v728_v41 = vadd.s32 %v1852_v52, %v711_v13  ;;  %v713_v13 = vadd.s32 96, %v1846_v50  ;;  %p1396_p2 = scmp.lt.s32.totalorder %s1978_s17, %s1394_s23  ;;  %p1397_p13 = scmp.lt.s32.totalorder %s1395_s0, %s1389_s12 }
 0x19b   : > { %vm738_vm0 = vcmp.lt.s32.totalorder %v720_v54, %v1856_v55  ;;  %vm736_vm1 = vcmp.lt.s32.totalorder %v718_v57, %v1856_v55  ;;  %vm737_vm2 = vcmp.lt.s32.totalorder %v719_v58, %v1856_v55  ;;  %vm739_vm3 = vcmp.lt.s32.totalorder %v721_v62, %v1856_v55  ;;  %p1391_p9 = pnand %p1390_p7, %p2041_p0 }
 0x19c   : > { %v1061_v1 = vsel %vm738_vm0, 1.0, %v1475_v0  ;;  %v1059_v11 = vsel %vm736_vm1, 1.0, %v1475_v0  ;;  %v1060_v33 = vsel %vm737_vm2, 1.0, %v1475_v0  ;;  %vm742_vm4 = vcmp.lt.s32.totalorder %v724_v7, %v1856_v55  ;;  %p1398_p6 = por %p1397_p13, %p1396_p2 }
 0x19d   : > { %vm740_vm5 = vcmp.lt.s32.totalorder %v722_v8, %v1856_v55  ;;  %v726_v43 = vadd.s32 %v1852_v52, %v709_v21  ;;  %v1065_v46 = vsel %vm742_vm4, 1.0, %v1475_v0  ;;  %vm743_vm6 = vcmp.lt.s32.totalorder %v725_v34, %v1856_v55  ;;  %p1392_p12 = pneg %p1391_p9 }
 0x19e   : > { %v1063_v47 = vsel %vm740_vm5, 1.0, %v1475_v0  ;;  %vm746_vm8 = vcmp.lt.s32.totalorder %v728_v41, %v1856_v55 }
 0x19f   : > { %vm744_vm9 = vcmp.lt.s32.totalorder %v726_v43, %v1856_v55  ;;  %v716_v43 = vadd.s32 120, %v1846_v50  ;;  %p1399_p10 = pnand %p1398_p6, %p1392_p12 }
 0x240   : > { %v1166_v63 = vpop.f32.mrb[0].mxu1 }
 0x241   : > { %v645_v3 = vadd.f32 %v1166_v63, %v1868_v61  ;;  %v636_v6 = vpop.f32.mrb[1].mxu1 }
 0x242   : > { %v637_v10 = vadd.f32 %v1868_v61, %v636_v6  ;;  %v1167_v12 = vpop.f32.mrb[2].mxu1 }
 0x243   : > { %v786_v14 = vsub.f32 %v645_v3, %v1717_v16  ;;  %v648_v15 = vadd.f32 %v1167_v12, %v1868_v61  ;;  %v639_v20 = vpop.f32.mrb[3].mxu1  ;;  %v723_v16 = vadd.s32 %v1852_v52, %v706_v9  ;;  %v1066_v3 = vsel %vm743_vm6, 1.0, %v1475_v0 }
 0x244   : > { %v784_v27 = vsub.f32 %v637_v10, %v1709_v4  ;;  %v640_v28 = vadd.f32 %v1868_v61, %v639_v20  ;;  %v1062_v4 = vsel %vm739_vm3, 1.0, %v1475_v0 }
 0x245   : > { %v787_v37 = vsub.f32 %v648_v15, %v1720_v17  ;;  %v802_v42 = vmul.f32 %v1061_v1, %v786_v14  ;;  %v729_v17 = vadd.s32 %v1852_v52, %v712_v22  ;;  %vm741_vm7 = vcmp.lt.s32.totalorder %v723_v16, %v1856_v55 }
 0x246   : > { %v800_v38 = vmul.f32 %v1059_v11, %v784_v27  ;;  %v785_v39 = vsub.f32 %v640_v28, %v1712_v5  ;;  %v710_v5 = vadd.s32 72, %v1846_v50  ;;  %v1064_v6 = vsel %vm741_vm7, 1.0, %v1475_v0 }
 0x247   : > { %v803_v48 = vmul.f32 %v1062_v4, %v787_v37  ;;  %v818_v57 = vmul.f32 %v802_v42, %v802_v42  ;;  %vm747_vm10 = vcmp.lt.s32.totalorder %v729_v17, %v1856_v55  ;;  %v1067_v11 = vsel %vm744_vm9, 1.0, %v1475_v0 }
 0x248   : > { %v801_v44 = vmul.f32 %v1060_v33, %v785_v39  ;;  %v1170_v45 = vpop.f32.mrb[4].mxu1  ;;  %v816_v51 = vmul.f32 %v800_v38, %v800_v38  ;;  %v727_v7 = vadd.s32 %v1852_v52, %v710_v5  ;;  %v1070_v12 = vsel %vm747_vm10, 1.0, %v1475_v0 }
 0x249   : > { %v661_v49 = vadd.f32 %v1170_v45, %v1868_v61  ;;  %v652_v40 = vpop.f32.mrb[5].mxu1  ;;  %v819_v2 = vmul.f32 %v803_v48, %v803_v48  ;;  %v714_v28 = vadd.s32 104, %v1846_v50  ;;  %v730_v42 = vadd.s32 %v1852_v52, %v713_v13 }
 0x24a   : > { %v817_v53 = vmul.f32 %v801_v44, %v801_v44  ;;  %v653_v54 = vadd.f32 %v1868_v61, %v652_v40  ;;  %v1171_v56 = vpop.f32.mrb[6].mxu1  ;;  %vm745_vm11 = vcmp.lt.s32.totalorder %v727_v7, %v1856_v55 }
 0x24b   : > { %v664_v58 = vadd.f32 %v1171_v56, %v1868_v61  ;;  %v655_v59 = vpop.f32.mrb[7].mxu1  ;;  %v790_v62 = vsub.f32 %v661_v49, %v1733_v23  ;;  %v1068_v48 = vsel %vm745_vm11, 1.0, %v1475_v0  ;;  %v731_v49 = vadd.s32 %v1852_v52, %v714_v28 }
 0x24c   : > { %v832_v60 = vadd.f32 %v817_v53, %v816_v51  ;;  %v788_v63 = vsub.f32 %v653_v54, %v1723_v18  ;;  %v656_v1 = vadd.f32 %v1868_v61, %v655_v59  ;;  %v1069_v18 = vsel %vm746_vm8, 1.0, %v1475_v0 }
 0x24d   : > { %v791_v10 = vsub.f32 %v664_v58, %v1736_v24  ;;  %v806_v14 = vmul.f32 %v1065_v46, %v790_v62  ;;  %vm748_vm12 = vcmp.lt.s32.totalorder %v730_v42, %v1856_v55  ;;  %vm749_vm14 = vcmp.lt.s32.totalorder %v731_v49, %v1856_v55 }
 0x24e   : > { %v833_v8 = vadd.f32 %v832_v60, %v818_v57  ;;  %v804_v9 = vmul.f32 %v1063_v47, %v788_v63  ;;  %v789_v23 = vsub.f32 %v656_v1, %v1726_v19  ;;  %v715_v19 = vadd.s32 112, %v1846_v50 }
 0x24f   : > { %v807_v34 = vmul.f32 %v1066_v3, %v791_v10  ;;  %v822_v17 = vmul.f32 %v806_v14, %v806_v14 }
 0x250   : > { %v820_v15 = vmul.f32 %v804_v9, %v804_v9  ;;  %v834_v20 = vadd.f32 %v833_v8, %v819_v2  ;;  %v805_v21 = vmul.f32 %v1064_v6, %v789_v23  ;;  %v1174_v22 = vpop.f32.mrb[8].mxu1  ;;  %v1071_v2 = vsel %vm748_vm12, 1.0, %v1475_v0 }
 0x251   : > { %v677_v27 = vadd.f32 %v1174_v22, %v1868_v61  ;;  %v668_v24 = vpop.f32.mrb[9].mxu1  ;;  %v823_v40 = vmul.f32 %v807_v34, %v807_v34 }
 0x252   : > { %v835_v33 = vadd.f32 %v834_v20, %v820_v15  ;;  %v821_v37 = vmul.f32 %v805_v21, %v805_v21  ;;  %v669_v16 = vadd.f32 %v1868_v61, %v668_v24  ;;  %v1175_v38 = vpop.f32.mrb[10].mxu1 }
 0x253   : > { %v794_v4 = vsub.f32 %v677_v27, %v1749_v29  ;;  %v680_v39 = vadd.f32 %v1175_v38, %v1868_v61  ;;  %v671_v41 = vpop.f32.mrb[11].mxu1  ;;  %v732_v29 = vadd.s32 %v1852_v52, %v715_v19 }
 0x254   : > { %v836_v44 = vadd.f32 %v835_v33, %v821_v37  ;;  %v792_v45 = vsub.f32 %v669_v16, %v1739_v25  ;;  %v672_v46 = vadd.f32 %v1868_v61, %v671_v41  ;;  %v733_v25 = vadd.s32 %v1852_v52, %v716_v43 }
 0x255   : > { %v795_v47 = vsub.f32 %v680_v39, %v1752_v30  ;;  %v810_v53 = vmul.f32 %v1069_v18, %v794_v4  ;;  %vm750_vm13 = vcmp.lt.s32.totalorder %v732_v29, %v1856_v55 }
 0x256   : > { %v837_v5 = vadd.f32 %v836_v44, %v822_v17  ;;  %v808_v51 = vmul.f32 %v1067_v11, %v792_v45  ;;  %v793_v50 = vsub.f32 %v672_v46, %v1742_v26  ;;  %vm751_vm15 = vcmp.lt.s32.totalorder %v733_v25, %v1856_v55 }
 0x257   : > { %v811_v58 = vmul.f32 %v1070_v12, %v795_v47  ;;  %v826_v52 = vmul.f32 %v810_v53, %v810_v53  ;;  %v1073_v18 = vsel %vm750_vm13, 1.0, %v1475_v0  ;;  %v1072_v11 = vsel %vm749_vm14, 1.0, %v1475_v0 }
 0x258   : > { %v824_v54 = vmul.f32 %v808_v51, %v808_v51  ;;  %v838_v56 = vadd.f32 %v837_v5, %v823_v40  ;;  %v809_v57 = vmul.f32 %v1068_v48, %v793_v50  ;;  %v1178_v30 = vpop.f32.mrb[12].mxu1 }
 0x259   : > { %v693_v59 = vadd.f32 %v1178_v30, %v1868_v61  ;;  %v684_v60 = vpop.f32.mrb[13].mxu1  ;;  %v827_v23 = vmul.f32 %v811_v58, %v811_v58 }
 0x25a   : > { %v839_v62 = vadd.f32 %v838_v56, %v824_v54  ;;  %v825_v63 = vmul.f32 %v809_v57, %v809_v57  ;;  %v685_v1 = vadd.f32 %v1868_v61, %v684_v60  ;;  %v1179_v26 = vpop.f32.mrb[14].mxu1 }
 0x25b   : > { %v696_v3 = vadd.f32 %v1179_v26, %v1868_v61  ;;  %v687_v6 = vpop.f32.mrb[15].mxu1  ;;  %v798_v8 = vsub.f32 %v693_v59, %v1765_v35  ;;  %v1074_v35 = vsel %vm751_vm15, 1.0, %v1475_v0 }
 0x25c   : > { %v840_v7 = vadd.f32 %v839_v62, %v825_v63  ;;  %v796_v9 = vsub.f32 %v685_v1, %v1755_v31  ;;  %v688_v10 = vadd.f32 %v1868_v61, %v687_v6 }
 0x25d   : > { %v799_v14 = vsub.f32 %v696_v3, %v1768_v36  ;;  %v814_v20 = vmul.f32 %v1073_v18, %v798_v8 }
 0x25e   : > { %v841_v12 = vadd.f32 %v840_v7, %v826_v52  ;;  %v812_v13 = vmul.f32 %v1071_v2, %v796_v9  ;;  %v797_v15 = vsub.f32 %v688_v10, %v1758_v32 }
 0x25f   : > { %v815_v27 = vmul.f32 %v1074_v35, %v799_v14  ;;  %v830_v24 = vmul.f32 %v814_v20, %v814_v20 }
 0x260   : > { %v828_v31 = vmul.f32 %v812_v13, %v812_v13  ;;  %v842_v21 = vadd.f32 %v841_v12, %v827_v23  ;;  %v813_v61 = vmul.f32 %v1072_v11, %v797_v15 }
 0x261   : > { %v831_v28 = vmul.f32 %v815_v27, %v815_v27 }
 0x262   : > { %v843_v22 = vadd.f32 %v842_v21, %v828_v31  ;;  %v829_v55 = vmul.f32 %v813_v61, %v813_v61 }
 0x264   : > { %v844_v19 = vadd.f32 %v843_v22, %v829_v55 }
 0x266   : > { %v845_v33 = vadd.f32 %v844_v19, %v830_v24 }
 0x268   : > { %v846_v34 = vadd.f32 %v845_v33, %v831_v28 }
 0x26a   : > { %v847_v36 = vrot.slane %v846_v34, 4 }
 0x26c   : > { %v848_v32 = vadd.f32 %v847_v36, %v846_v34 }
 0x26e   : > { %v849_v37 = vrot.slane %v848_v32, 2 }
 0x270   : > { %v850_v0 = vadd.f32 %v849_v37, %v848_v32 }
 0x272   : > { %v851_v16 = vrot.slane %v850_v0, 1 }
 0x274   : > { %v852_v38 = vadd.f32 %v851_v16, %v850_v0 }
 0x276   : > { %853 = vst [vmem:[%s311_s24] sm:$0xff] %v852_v38 }
 0x277   : > { %1402 = shalt.err (!%p1399_p10)
}
 0x278   : > { %s1403_s18 = scalar_lea.hbm %s1976_s19, 128  ;;  %s1407_s25 = scalar_lea.hbm %s2027_s7, 256 }
 0x279   : > { %p1404_p4 = scmp.ne.s32.totalorder %s1976_s19, %s1403_s18  ;;  %p1408_p11 = scmp.lt.u32.totalorder %s1976_s19, %s2027_s7 }
 0x27a   : > { %p1409_p1 = scmp.lt.u32.totalorder %s1407_s25, %s1403_s18  ;;  %p1411_p7 = scmp.lt.u32.totalorder %s1403_s18, %s1976_s19 }
 0x27b   : > { %p1405_p5 = pnand %p1404_p4, %p2041_p0 }
 0x27c   : > { %p1410_p3 = por %p1409_p1, %p1408_p11 }
 0x27d   : > { %p1406_p8 = pneg %p1405_p5 }
 0x27e   : > { %p1412_p9 = por %p1411_p7, %p1410_p3 }
 0x280   : > { %p1413_p12 = pnand %p1412_p9, %p1406_p8 }
 0x282   : > { %1416 = shalt.err (!%p1413_p12)
}
 0x283   : > { %1191 = dma.vmem_to_hbm [thread:$0]  (%p2041_p0), %s1978_s17, 128, %s1976_s19, %s876_s21  }
 0x284 PF: > { %s917_s24 = sand.u32 1, %s1451_s26   ;;  %p2042_p2 = scmp.ne.s32.totalorder %s2032_s9, 0 }
 0x285   : > { %p2043_p13 = scmp.ge.s32.totalorder %s1463_s29, 2  ;;  %s918_s8 = scalar_lea.sflag [#allocation6], %s917_s24 }
 0x287   : > { %p1206_p6 = pnand %p2043_p13, %p2042_p2 }
 0x289   : > { %1442 = dma.done.wait (!%p1206_p6), %s918_s8, 2048  }
 0x28a   : > { %1444 = vsyncadd (!%p1206_p6), %s918_s8, 4294965248  ;;  %s927_s10 = scalar_lea.sflag [#allocation12], %s917_s24 }
 0x28b   : > { %1446 = dma.done.wait (!%p1206_p6), %s927_s10, 128  }
 0x28c   : > { %1448 = vsyncadd (!%p1206_p6), %s927_s10, 4294967168  ;;  %p26_p0 = scmp.ge.s32.totalorder %s1630_s30, 4   ;;  %s2044_s26 = smov %s1455_s27 }
 0x28d   : > { %s2045_s27 = smov %s1459_s28  ;;  %s2046_s28 = smov %s1646_s16 }
 0x28e   : > { %s2047_s29 = smov %s1630_s30  ;;  %28 = sbr.rel (!%p26_p0) target bundleno = 10 (0xa), region = 110 }
 0x295   :  { %932 = vsyncpa [#allocation5], 1 }
 0x296   :  { %934 = vsyncpa [#allocation5 + $0x1], 1 }
 0x297   :  { %935 = vsyncpa [#allocation8], 1 }
 0x298   :  { %936 = vsyncpa [#allocation6], 1 }
 0x299   :  { %938 = vsyncpa [#allocation6 + $0x1], 1 }
 0x29a   :  { %939 = vsyncpa [#allocation12], 1 }
 0x29b   :  { %941 = vsyncpa [#allocation12 + $0x1], 1 }

</bundles_post_ra>
